<compile_context>
chip_gen: v7x
topology: tpu7x:2x2x1
jax: 0.10.0
libtpu: 0.0.40
codegen_flags: <defaults>
</compile_context>

<pallas_src>
import functools

import jax
import jax.numpy as jnp
from jax import lax
from jax.experimental import pallas as pl
from jax.experimental.pallas import tpu as pltpu


def _simclr_kernel(anchor_ref, v0t_ref, v1t_ref, out_ref, *, inv_temp):
    """Per-row-tile SimCLR loss body.

    anchor_ref : (TM, Dp)   row tile of view-0 features (the anchors)
    v0t_ref    : (Dp, B)    view-0 features, transposed (VMEM-resident across tiles)
    v1t_ref    : (Dp, B)    view-1 features, transposed (VMEM-resident across tiles)
    out_ref    : (TM, 128)  per-row -log p(positive), broadcast across lanes
    """
    tm = anchor_ref.shape[0]
    b = v0t_ref.shape[1]
    row0 = pl.program_id(0) * tm

    # Fold 1/temperature into the small operand; keep native dtype for the MXU.
    anchor = anchor_ref[...] * inv_temp

    # logits = [anchor @ view0^T | anchor @ view1^T] / temperature, f32 accumulation.
    s0 = jnp.dot(anchor, v0t_ref[...], preferred_element_type=jnp.float32)  # (TM, B)
    s1 = jnp.dot(anchor, v1t_ref[...], preferred_element_type=jnp.float32)  # (TM, B)

    rows = lax.broadcasted_iota(jnp.int32, (tm, b), 0) + row0
    cols = lax.broadcasted_iota(jnp.int32, (tm, b), 1)
    is_diag = cols == rows   # in s0: self-similarity; in s1: the positive (col i+b)

    # Numerically stable log-softmax over all 2B columns (self kept in the max,
    # matching the PyTorch reference).
    row_max = jnp.maximum(jnp.max(s0, axis=1, keepdims=True),
                          jnp.max(s1, axis=1, keepdims=True))
    e0 = jnp.where(is_diag, 0.0, jnp.exp(s0 - row_max))   # exclude self-similarity
    e1 = jnp.exp(s1 - row_max)
    denom = jnp.sum(e0, axis=1, keepdims=True) + jnp.sum(e1, axis=1, keepdims=True)

    # Exactly one positive per row -> its logit is the diagonal of s1; no
    # pos-mask multiply / extra row reduce / divide-by-count needed.
    pos = jnp.sum(jnp.where(is_diag, s1, 0.0), axis=1, keepdims=True)       # (TM, 1)
    neg_log_prob = row_max + jnp.log(denom) - pos                            # (TM, 1)

    # Lane-dense (unmasked) store.
    out_ref[...] = jnp.broadcast_to(neg_log_prob, (tm, 128))


def simclr_loss(features, temperature, *, tm=128):
    """features: (b, 2, dim). Returns scalar SimCLR loss (float32)."""
    b, n, dim = features.shape
    assert n == 2

    view0 = features[:, 0]        # (b, dim) -- also the anchors
    view1 = features[:, 1]        # (b, dim)

    # Pad the contraction dim K to a multiple of 128 (zeros don't change dots).
    dim_p = pl.cdiv(dim, 128) * 128
    if dim_p != dim:
        pad_d = ((0, 0), (0, dim_p - dim))
        view0 = jnp.pad(view0, pad_d)
        view1 = jnp.pad(view1, pad_d)

    # Pre-transpose the resident contrast operands once in the wrapper so the
    # kernel issues NN matmuls (no per-tile transpose of the RHS).
    v0t = view0.T                 # (dim_p, b)
    v1t = view1.T                 # (dim_p, b)

    # Row-tile the anchors; pad rows so the grid divides evenly. Padded rows
    # produce finite values that the final mean simply ignores.
    tm = min(tm, b)
    b_pad = pl.cdiv(b, tm) * tm
    anchor = view0 if b_pad == b else jnp.pad(view0, ((0, b_pad - b), (0, 0)))
    num_tiles = b_pad // tm

    # Rough VMEM budget (resident contrast + double-buffered anchor + f32 temps),
    # clamped so it stays valid on v7x's 64 MiB physical VMEM.
    itemsize = jnp.dtype(features.dtype).itemsize
    est_vmem = (2 * dim_p * b * itemsize) * 2 + (tm * dim_p * itemsize) * 2 \
               + 8 * (tm * b * 4) + 2 * (tm * 128 * 4)
    vmem_limit = int(min(64 * 1024 * 1024, max(32 * 1024 * 1024, 2 * est_vmem)))

    out = pl.pallas_call(
        functools.partial(_simclr_kernel, inv_temp=1.0 / float(temperature)),
        out_shape=jax.ShapeDtypeStruct((b_pad, 128), jnp.float32),
        grid_spec=pltpu.PrefetchScalarGridSpec(
            num_scalar_prefetch=0,
            grid=(num_tiles,),
            in_specs=[
                pl.BlockSpec((tm, dim_p), lambda i: (i, 0)),   # anchor row tile
                pl.BlockSpec((dim_p, b), lambda i: (0, 0)),    # resident view0^T
                pl.BlockSpec((dim_p, b), lambda i: (0, 0)),    # resident view1^T
            ],
            out_specs=pl.BlockSpec((tm, 128), lambda i: (i, 0)),
        ),
        compiler_params=pltpu.CompilerParams(
            dimension_semantics=("parallel",),
            vmem_limit_bytes=vmem_limit,
        ),
    )(anchor, v0t, v1t)

    per_row_neg_log_prob = out[:b, 0]
    return jnp.mean(per_row_neg_log_prob)


def _reference_simclr_loss(features, temperature):
    """Pure-JAX mirror of the PyTorch module, for sanity checking."""
    b, n, dim = features.shape
    anchor = features[:, 0]
    contrast = jnp.concatenate([features[:, 0], features[:, 1]], axis=0)
    dot = (anchor @ contrast.T) / temperature
    logits = dot - jnp.max(dot, axis=1, keepdims=True)
    eye = jnp.eye(b, dtype=jnp.float32)
    mask = jnp.tile(eye, (1, 2))
    logits_mask = jnp.ones((b, 2 * b), jnp.float32).at[
        jnp.arange(b), jnp.arange(b)].set(0.0)
    mask = mask * logits_mask
    exp_logits = jnp.exp(logits) * logits_mask
    log_prob = logits - jnp.log(jnp.sum(exp_logits, axis=1, keepdims=True))
    return -jnp.mean(jnp.sum(mask * log_prob, axis=1) / jnp.sum(mask, axis=1))


if __name__ == "__main__":
    key = jax.random.PRNGKey(0)
    b, n, dim = 8, 2, 32
    temperature = 0.5
    features = jax.random.normal(key, (b, n, dim), dtype=jnp.float32)
    # SimCLR features are typically L2-normalized; do it here for realism.
    features = features / jnp.linalg.norm(features, axis=-1, keepdims=True)

    loss = jax.block_until_ready(simclr_loss(features, temperature))
    ref = jax.block_until_ready(_reference_simclr_loss(features, temperature))
    assert jnp.allclose(loss, ref, rtol=1e-5, atol=1e-5), (loss, ref)
    print("KERNEL_OK")
</pallas_src>

<mosaic_0001>
module attributes {stable_mosaic.version = 11 : i64} {
  func.func @_simclr_kernel(%arg0: i32, %arg1: memref<8x128xf32, #tpu.memory_space<vmem>>, %arg2: memref<128x8xf32, #tpu.memory_space<vmem>>, %arg3: memref<128x8xf32, #tpu.memory_space<vmem>>, %arg4: memref<8x128xf32, #tpu.memory_space<vmem>>) attributes {dimension_semantics = [#tpu.dimension_semantics<parallel>], iteration_bounds = array<i64: 1>, scalar_prefetch = 0 : i64, scratch_operands = 0 : i64, tpu.core_type = #tpu.core_type<tc>, window_params = [{transform_indices = @transform_0, window_bounds = array<i64: 8, 128>}, {pipeline_mode = #tpu.pipeline_mode<synchronous>, transform_indices = @transform_1, window_bounds = array<i64: 128, 8>}, {pipeline_mode = #tpu.pipeline_mode<synchronous>, transform_indices = @transform_2, window_bounds = array<i64: 128, 8>}, {transform_indices = @transform_3, window_bounds = array<i64: 8, 128>}]} {
    %c8_i32 = arith.constant 8 : i32
    %0 = arith.muli %arg0, %c8_i32 : i32
    %c0 = arith.constant 0 : index
    %c0_0 = arith.constant 0 : index
    %1 = vector.load %arg1[%c0, %c0_0] : memref<8x128xf32, #tpu.memory_space<vmem>>, vector<8x128xf32>
    %cst = arith.constant 2.000000e+00 : f32
    %2 = vector.broadcast %cst : f32 to vector<8x128xf32>
    %3 = arith.mulf %1, %2 : vector<8x128xf32>
    %c0_1 = arith.constant 0 : index
    %c0_2 = arith.constant 0 : index
    %4 = vector.load %arg2[%c0_1, %c0_2] : memref<128x8xf32, #tpu.memory_space<vmem>>, vector<128x8xf32>
    %cst_3 = arith.constant dense<0.000000e+00> : vector<8x8xf32>
    %5 = tpu.matmul %3, %4, %cst_3 {dimension_numbers = #tpu.dot_dimension_numbers<[1], [0], [0], [1], [0, 0, 1, 1], [], []>} : vector<8x128xf32>, vector<128x8xf32>, vector<8x8xf32> -> vector<8x8xf32>
    %c0_4 = arith.constant 0 : index
    %c0_5 = arith.constant 0 : index
    %6 = vector.load %arg3[%c0_4, %c0_5] : memref<128x8xf32, #tpu.memory_space<vmem>>, vector<128x8xf32>
    %cst_6 = arith.constant dense<0.000000e+00> : vector<8x8xf32>
    %7 = tpu.matmul %3, %6, %cst_6 {dimension_numbers = #tpu.dot_dimension_numbers<[1], [0], [0], [1], [0, 0, 1, 1], [], []>} : vector<8x128xf32>, vector<128x8xf32>, vector<8x8xf32> -> vector<8x8xf32>
    %8 = tpu.iota {dimensions = array<i32: 0>} : vector<8x8xi32>
    %9 = vector.broadcast %0 : i32 to vector<8x8xi32>
    %10 = arith.addi %8, %9 : vector<8x8xi32>
    %11 = tpu.iota {dimensions = array<i32: 1>} : vector<8x8xi32>
    %12 = arith.cmpi eq, %11, %10 : vector<8x8xi32>
    %cst_7 = arith.constant dense<0xFF800000> : vector<8xf32>
    %13 = vector.multi_reduction <maximumf>, %5, %cst_7 [1] : vector<8x8xf32> to vector<8xf32>
    %14 = vector.shape_cast %13 : vector<8xf32> to vector<8x1xf32>
    %cst_8 = arith.constant dense<0xFF800000> : vector<8xf32>
    %15 = vector.multi_reduction <maximumf>, %7, %cst_8 [1] : vector<8x8xf32> to vector<8xf32>
    %16 = vector.shape_cast %15 : vector<8xf32> to vector<8x1xf32>
    %17 = arith.maximumf %14, %16 : vector<8x1xf32>
    %18 = vector.broadcast %17 : vector<8x1xf32> to vector<8x8xf32>
    %19 = arith.subf %5, %18 : vector<8x8xf32>
    %20 = math.exp %19 : vector<8x8xf32>
    %cst_9 = arith.constant 0.000000e+00 : f32
    %21 = vector.broadcast %cst_9 : f32 to vector<8x8xf32>
    %22 = arith.select %12, %21, %20 : vector<8x8xi1>, vector<8x8xf32>
    %23 = vector.broadcast %17 : vector<8x1xf32> to vector<8x8xf32>
    %24 = arith.subf %7, %23 : vector<8x8xf32>
    %25 = math.exp %24 : vector<8x8xf32>
    %cst_10 = arith.constant dense<0.000000e+00> : vector<8xf32>
    %26 = vector.multi_reduction <add>, %22, %cst_10 [1] : vector<8x8xf32> to vector<8xf32>
    %27 = vector.shape_cast %26 : vector<8xf32> to vector<8x1xf32>
    %cst_11 = arith.constant dense<0.000000e+00> : vector<8xf32>
    %28 = vector.multi_reduction <add>, %25, %cst_11 [1] : vector<8x8xf32> to vector<8xf32>
    %29 = vector.shape_cast %28 : vector<8xf32> to vector<8x1xf32>
    %30 = arith.addf %27, %29 : vector<8x1xf32>
    %cst_12 = arith.constant 0.000000e+00 : f32
    %31 = vector.broadcast %cst_12 : f32 to vector<8x8xf32>
    %32 = arith.select %12, %7, %31 : vector<8x8xi1>, vector<8x8xf32>
    %cst_13 = arith.constant dense<0.000000e+00> : vector<8xf32>
    %33 = vector.multi_reduction <add>, %32, %cst_13 [1] : vector<8x8xf32> to vector<8xf32>
    %34 = vector.shape_cast %33 : vector<8xf32> to vector<8x1xf32>
    %35 = math.log %30 : vector<8x1xf32>
    %36 = arith.addf %17, %35 : vector<8x1xf32>
    %37 = arith.subf %36, %34 : vector<8x1xf32>
    %38 = vector.shape_cast %37 : vector<8x1xf32> to vector<8x1xf32>
    %39 = vector.broadcast %38 : vector<8x1xf32> to vector<8x128xf32>
    %c0_14 = arith.constant 0 : index
    %c0_15 = arith.constant 0 : index
    %40 = vector.load %arg4[%c0_14, %c0_15] : memref<8x128xf32, #tpu.memory_space<vmem>>, vector<8x128xf32>
    tpu.vector_store %arg4[%c0_14, %c0_15], %39 {strides = array<i32>} : memref<8x128xf32, #tpu.memory_space<vmem>>, vector<8x128xf32>,
    return
  }
  func.func @transform_0(%arg0: i32) -> (i32, i32) {
    %c0_i32 = arith.constant 0 : i32
    %c0_i32_0 = arith.constant 0 : i32
    return %arg0, %c0_i32 : i32, i32
  }
  func.func @transform_1(%arg0: i32) -> (i32, i32) {
    %c0_i32 = arith.constant 0 : i32
    %c0_i32_0 = arith.constant 0 : i32
    %c0_i32_1 = arith.constant 0 : i32
    return %c0_i32, %c0_i32_0 : i32, i32
  }
  func.func @transform_2(%arg0: i32) -> (i32, i32) {
    %c0_i32 = arith.constant 0 : i32
    %c0_i32_0 = arith.constant 0 : i32
    %c0_i32_1 = arith.constant 0 : i32
    return %c0_i32, %c0_i32_0 : i32, i32
  }
  func.func @transform_3(%arg0: i32) -> (i32, i32) {
    %c0_i32 = arith.constant 0 : i32
    %c0_i32_0 = arith.constant 0 : i32
    return %arg0, %c0_i32 : i32, i32
  }
}

</mosaic_0001>

<bundles_post_ra>
// kernel: tpu_custom_call.1
= control target key start
LH: loop header
LB: loop body
LE: loop exit
PB: predicated region body
PF: predicated region fallthrough
CT: control target
= control target key end

     0   :  { %v428_v3 = vmov 0.0|0.0   ;;  %vm429_vm0 = vmmov 0   ;;  %v430_v11 = vmov 0.0   ;;  %s584_s0 = inlined_call_operand.vmem [shape: f32[8,128], index: 0, kind: input, shape index: {}]   ;;  %s585_s1 = inlined_call_operand.vmem [shape: f32[128,8], index: 1, kind: input, shape index: {}]   ;;  %s586_s2 = inlined_call_operand.vmem [shape: f32[128,8], index: 2, kind: input, shape index: {}]   ;;  %s587_s3 = inlined_call_operand.hbm [shape: f32[8,128], index: 3, kind: output, shape index: {}]  }
   0x1   :  { %v18_v0 = vld [vmem:[%s585_s1] sm:$0xff]  ;;  %v19_v1 = vld [vmem:[%s585_s1 + $0x8] sm:$0xff]  ;;  %346 = vmatprep.subr.bf16.mxu0 %v428_v3  ;;  %370 = vmatprep.subr.bf16.mxu1 %v428_v3  ;;  %v20_v6 = vld [vmem:[%s585_s1 + $0x10] sm:$0xff] }
   0x2   :  { %v104_v2 = vld [vmem:[%s586_s2] sm:$0xff]  ;;  %v347_v4 = vpack.c.bf16 %v19_v1, %v18_v0  ;;  %v105_v5 = vld [vmem:[%s586_s2 + $0x8] sm:$0xff]  ;;  %v21_v7 = vld [vmem:[%s585_s1 + $0x18] sm:$0xff]  ;;  %308 = vmatprep.mubr.msk.f32.mxu0 %vm429_vm0, %v430_v11  ;;  %343 = vmatprep.mubr.msk.f32.mxu1 %vm429_vm0, %v430_v11 }
   0x3   :  { %v371_v8 = vpack.c.bf16 %v105_v5, %v104_v2  ;;  %v106_v9 = vld [vmem:[%s586_s2 + $0x10] sm:$0xff]  ;;  %v107_v10 = vld [vmem:[%s586_s2 + $0x18] sm:$0xff]  ;;  %v350_v12 = vpack.c.bf16 %v21_v7, %v20_v6  ;;  %v22_v14 = vld [vmem:[%s585_s1 + $0x20] sm:$0xff] }
   0x4   :  { %348 = vmatpush3.bf16.msra.mxu0 %v347_v4  ;;  %v374_v13 = vpack.c.bf16 %v107_v10, %v106_v9  ;;  %v23_v15 = vld [vmem:[%s585_s1 + $0x28] sm:$0xff]  ;;  %v108_v16 = vld [vmem:[%s586_s2 + $0x20] sm:$0xff]  ;;  %v24_v20 = vld [vmem:[%s585_s1 + $0x30] sm:$0xff] }
   0x5   :  { %349 = vmatprep.subr.bf16.mxu0 %v428_v3  ;;  %372 = vmatpush3.bf16.msra.mxu1 %v371_v8  ;;  %v109_v17 = vld [vmem:[%s586_s2 + $0x28] sm:$0xff]  ;;  %v353_v18 = vpack.c.bf16 %v23_v15, %v22_v14  ;;  %v25_v21 = vld [vmem:[%s585_s1 + $0x38] sm:$0xff]  ;;  %v110_v22 = vld [vmem:[%s586_s2 + $0x30] sm:$0xff] }
   0x6   :  { %373 = vmatprep.subr.bf16.mxu1 %v428_v3  ;;  %v377_v19 = vpack.c.bf16 %v109_v17, %v108_v16  ;;  %v111_v23 = vld [vmem:[%s586_s2 + $0x38] sm:$0xff]  ;;  %v356_v24 = vpack.c.bf16 %v25_v21, %v24_v20 }
   0x8   :  { %351 = vmatpush3.bf16.msra.mxu0 %v350_v12 }
   0x9   :  { %352 = vmatprep.subr.bf16.mxu0 %v428_v3  ;;  %375 = vmatpush3.bf16.msra.mxu1 %v374_v13 }
   0xa   :  { %376 = vmatprep.subr.bf16.mxu1 %v428_v3 }
   0xc   :  { %354 = vmatpush3.bf16.msra.mxu0 %v353_v18 }
   0xd   :  { %8 = vsyncpa [#allocation3], 0  ;;  %355 = vmatprep.subr.bf16.mxu0 %v428_v3  ;;  %378 = vmatpush3.bf16.msra.mxu1 %v377_v19  ;;  %v380_v25 = vpack.c.bf16 %v111_v23, %v110_v22  ;;  %v26_v26 = vld [vmem:[%s585_s1 + $0x40] sm:$0xff]  ;;  %v27_v27 = vld [vmem:[%s585_s1 + $0x48] sm:$0xff]  ;;  %v190_v52 = vlaneseq  ;;  %vm197_vm1 = vcmask 64512  }
   0xe   :  { %379 = vmatprep.subr.bf16.mxu1 %v428_v3  ;;  %v112_v28 = vld [vmem:[%s586_s2 + $0x40] sm:$0xff]  ;;  %v113_v29 = vld [vmem:[%s586_s2 + $0x48] sm:$0xff]  ;;  %v359_v30 = vpack.c.bf16 %v27_v27, %v26_v26  ;;  %v28_v32 = vld [vmem:[%s585_s1 + $0x50] sm:$0xff] }
   0xf   :  { %v383_v31 = vpack.c.bf16 %v113_v29, %v112_v28  ;;  %v29_v33 = vld [vmem:[%s585_s1 + $0x58] sm:$0xff]  ;;  %v114_v34 = vld [vmem:[%s586_s2 + $0x50] sm:$0xff]  ;;  %v30_v38 = vld [vmem:[%s585_s1 + $0x60] sm:$0xff]  ;;  %v191_v53 = vshrl.u32 %v190_v52, 7  ;;  %v195_v54 = vand.u32 127, %v190_v52 }
  0x10   :  { %357 = vmatpush3.bf16.msra.mxu0 %v356_v24  ;;  %v115_v35 = vld [vmem:[%s586_s2 + $0x58] sm:$0xff]  ;;  %v362_v36 = vpack.c.bf16 %v29_v33, %v28_v32  ;;  %v31_v39 = vld [vmem:[%s585_s1 + $0x68] sm:$0xff]  ;;  %v116_v40 = vld [vmem:[%s586_s2 + $0x60] sm:$0xff] }
  0x11   :  { %358 = vmatprep.subr.bf16.mxu0 %v428_v3  ;;  %381 = vmatpush3.bf16.msra.mxu1 %v380_v25  ;;  %v386_v37 = vpack.c.bf16 %v115_v35, %v114_v34  ;;  %v117_v41 = vld [vmem:[%s586_s2 + $0x68] sm:$0xff]  ;;  %v365_v42 = vpack.c.bf16 %v31_v39, %v30_v38  ;;  %v32_v44 = vld [vmem:[%s585_s1 + $0x70] sm:$0xff]  ;;  %v33_v45 = vld [vmem:[%s585_s1 + $0x78] sm:$0xff]  ;;  %vm196_vm2 = vcmp.eq.s32.totalorder %v195_v54, %v191_v53 }
  0x12   :  { %382 = vmatprep.subr.bf16.mxu1 %v428_v3  ;;  %v389_v43 = vpack.c.bf16 %v117_v41, %v116_v40  ;;  %v118_v46 = vld [vmem:[%s586_s2 + $0x70] sm:$0xff]  ;;  %v119_v47 = vld [vmem:[%s586_s2 + $0x78] sm:$0xff]  ;;  %v368_v48 = vpack.c.bf16 %v33_v45, %v32_v44  ;;  %v16_v49 = vld [vmem:[%s584_s0] sm:$0xff]  ;;  %s431_s0 = smov [#allocation2]  }
  0x13   :  { %v392_v50 = vpack.c.bf16 %v119_v47, %v118_v46  ;;  %v17_v51 = vmul.f32 2.0, %v16_v49  ;;  %s234_s1 = sshll.u32 %s431_s0, 4  ;;  %s235_s1 = int_to_ptr.vmem [resolvable:$true] %s234_s1 }
  0x14   :  { %360 = vmatpush3.bf16.msra.mxu0 %v359_v30  ;;  %s404_s2 = scalar_lea.vmem %s235_s1, 128  ;;  %p409_p1 = scmp.lt.s32.totalorder %s235_s1, %s235_s1 }
  0x15   :  { %361 = vmatprep.subr.bf16.mxu0 %v428_v3  ;;  %384 = vmatpush3.bf16.msra.mxu1 %v383_v31  ;;  %p405_p0 = scmp.ne.s32.totalorder %s235_s1, %s404_s2  ;;  %p410_p2 = scmp.lt.s32.totalorder %s404_s2, %s404_s2 }
  0x16   :  { %385 = vmatprep.subr.bf16.mxu1 %v428_v3 }
  0x17   :  { %p411_p3 = por %p410_p2, %p409_p1 }
  0x18   :  { %363 = vmatpush3.bf16.msra.mxu0 %v362_v36 }
  0x19   :  { %364 = vmatprep.subr.bf16.mxu0 %v428_v3  ;;  %387 = vmatpush3.bf16.msra.mxu1 %v386_v37  ;;  %p412_p4 = pnand %p411_p3, %p405_p0 }
  0x1a   :  { %388 = vmatprep.subr.bf16.mxu1 %v428_v3 }
  0x1c   :  { %366 = vmatpush3.bf16.msra.mxu0 %v365_v42 }
  0x1d   :  { %367 = vmatprep.subr.bf16.mxu0 %v428_v3  ;;  %390 = vmatpush3.bf16.msra.mxu1 %v389_v43 }
  0x1e   :  { %391 = vmatprep.subr.bf16.mxu1 %v428_v3 }
  0x20   :  { %369 = vmatpush3.bf16.msra.mxu0 %v368_v48 }
  0x21   :  { %393 = vmatpush3.bf16.msra.mxu1 %v392_v50 }
  0x23   :  { %309 = vmatmul.mubr.f32.vlgmr.msra.gmra.mrb[0].mxu0 %v17_v51 }
  0x24   :  { %344 = vmatmul.mubr.f32.vlgmr.msra.gmra.mrb[0].mxu1 %v17_v51 }
  0xf6   :  { %v100_v55 = vpop.f32.mrb[0].mxu0 }
  0xf7   :  { %v310_v56 = vpop.f32.mrb[1].mxu0  ;;  %v198_v57 = vsel %vm197_vm1, %v100_v55, -inf  ;;  %v186_v58 = vpop.f32.mrb[0].mxu1 }
  0xf8   :  { %199 = vmax.xlane.f32.xlu0 %v198_v57  ;;  %v345_v59 = vpop.f32.mrb[1].mxu1  ;;  %v201_v60 = vsel %vm197_vm1, %v186_v58, -inf  ;;  %v219_v61 = vsel %vm196_vm2, %v186_v58, 0.0 }
  0xf9   :  { %v220_v62 = vsel %vm197_vm1, %v219_v61, 0.0 }
  0xfc   :  { %202 = vmax.xlane.f32.xlu0 %v201_v60 }
 0x100   :  { %221 = vadd.xlane.f32.xlu0 %v220_v62 }
 0x185   :  { %v200_v63 = vpop.xlane.xlu0 %199 }
 0x189   :  { %v203_v0 = vpop.xlane.xlu0 %202 }
 0x18a   :  { %v204_v1 = vmax.f32 %v200_v63, %v203_v0 }
 0x18c   :  { %v205_v2 = vsub.f32 %v100_v55, %v204_v1  ;;  %v209_v3 = vsub.f32 %v186_v58, %v204_v1 }
 0x18d   :  { %v222_v17 = vpop.xlane.xlu0 %221 }
 0x18e   :  { %v206_v4 = vmul.f32 1.442695, %v205_v2  ;;  %v210_v5 = vmul.f32 1.442695, %v209_v3 }
 0x190   :  { %398 = vpow2.f32 %v206_v4 }
 0x191   :  { %400 = vpow2.f32 %v210_v5 }
 0x19a   :  { %v399_v6 = vpop.eup %398 }
 0x19b   :  { %v208_v7 = vsel %vm196_vm2, 0.0, %v399_v6  ;;  %v401_v9 = vpop.eup %400 }
 0x19c   :  { %v212_v8 = vsel %vm197_vm1, %v208_v7, 0.0  ;;  %v215_v10 = vsel %vm197_vm1, %v401_v9, 0.0 }
 0x19d   :  { %213 = vadd.xlane.f32.xlu1 %v212_v8 }
 0x1a1   :  { %216 = vadd.xlane.f32.xlu1 %v215_v10 }
 0x22a   :  { %v214_v11 = vpop.xlane.xlu1 %213 }
 0x22e   :  { %v217_v12 = vpop.xlane.xlu1 %216 }
 0x22f   :  { %v218_v13 = vadd.f32 %v217_v12, %v214_v11 }
 0x231   :  { %402 = vlog2.f32 %v218_v13 }
 0x23b   :  { %v403_v14 = vpop.eup %402 }
 0x23c   :  { %v224_v15 = vmul.f32 0.6931472, %v403_v14 }
 0x23e   :  { %v225_v16 = vadd.f32 %v224_v15, %v204_v1 }
 0x240   :  { %v226_v18 = vsub.f32 %v225_v16, %v222_v17 }
 0x242   :  { %227 = vst [vmem:[#allocation2] sm:$0xff] %v226_v18 }
 0x243   :  { %415 = shalt.err (!%p412_p4)
}
 0x244   :  { %s416_s26 = scalar_lea.hbm %s587_s3, 128 }
 0x245   :  { %p417_p5 = scmp.ne.s32.totalorder %s587_s3, %s416_s26  ;;  %p420_p6 = scmp.lt.u32.totalorder %s416_s26, %s587_s3 }
 0x247   :  { %p422_p7 = pnand %p420_p6, %p417_p5 }
 0x249   :  { %425 = shalt.err (!%p422_p7)
}
 0x24a   :  { %237 = dma.vmem_to_hbm [thread:$0]  %s235_s1, 128, %s587_s3, [#allocation3]  }
 0x24b   :  { %426 = dma.done.wait [#allocation3], 128  }
 0x24c   :  { %427 = vsyncadd [#allocation3], 4294967168 }
 0x24d   :  { %241 = vsyncpa [#allocation3], 1 }

</bundles_post_ra>
